<compile_context>
chip_gen: v6e
topology: v6e:2x2x1
jax: 0.10.0
libtpu: 0.0.40
codegen_flags: <defaults>
</compile_context>

<pallas_src>
import math
import functools

import numpy as np
import jax
import jax.numpy as jnp
from jax import lax
from jax.experimental import pallas as pl
from jax.experimental.pallas import tpu as pltpu


# -----------------------------------------------------------------------------
# Buffer setup (plain JAX glue) — mirrors PositionalEncoding.__init__
# -----------------------------------------------------------------------------
def make_positional_encoding_table(max_len: int, d_model: int) -> jnp.ndarray:
    """Builds the `pe` buffer of shape (max_len, 1, d_model), same math as PyTorch."""
    position = jnp.arange(max_len, dtype=jnp.float32)[:, None]              # (max_len, 1)
    div_term = jnp.exp(
        jnp.arange(0, d_model, 2, dtype=jnp.float32) * (-math.log(10000.0) / d_model)
    )                                                                        # (d_model/2,)
    ang = position * div_term                                                # (max_len, d_model/2)
    pe = jnp.zeros((max_len, d_model), jnp.float32)
    pe = pe.at[:, 0::2].set(jnp.sin(ang))
    pe = pe.at[:, 1::2].set(jnp.cos(ang))
    return pe[:, None, :]                                                    # (max_len, 1, d_model)


# -----------------------------------------------------------------------------
# Pallas kernel: hot path = elementwise add of pe + (inverted) dropout
# -----------------------------------------------------------------------------
def _pos_enc_kernel(seed_ref, x_ref, pe_ref, o_ref, *,
                    dropout_p: float, training: bool, compute_dtype):
    # x tile: (TS, B, D); pe tile: (TS, 1, D) — sublane broadcast over batch.
    y = x_ref[...].astype(compute_dtype) + pe_ref[...].astype(compute_dtype)

    if training and 0.0 < dropout_p < 1.0:
        TS, B, D = x_ref.shape
        # Global element counter (independent of the tiling): unique per element,
        # mixes in the tile index via program_id so every tile / TensorCore draws
        # a distinct stream.
        r = lax.broadcasted_iota(jnp.int32, (TS, B, D), 0).astype(jnp.uint32)
        b = lax.broadcasted_iota(jnp.int32, (TS, B, D), 1).astype(jnp.uint32)
        d = lax.broadcasted_iota(jnp.int32, (TS, B, D), 2).astype(jnp.uint32)
        seq0 = (pl.program_id(0) * TS).astype(jnp.uint32)
        g = ((seq0 + r) * jnp.uint32(B) + b) * jnp.uint32(D) + d

        # murmur3 fmix32 of (counter ^ seed): cheap, well-distributed u32 bits.
        h = g ^ seed_ref[0].astype(jnp.uint32)
        h = (h ^ (h >> 16)) * jnp.uint32(0x85EBCA6B)
        h = (h ^ (h >> 13)) * jnp.uint32(0xC2B2AE35)
        h = h ^ (h >> 16)

        # Integer-threshold compare: P(h < thresh) = dropout_p  =>  drop when h < thresh.
        thresh = jnp.uint32(min(int(round(dropout_p * 2.0**32)), 2**32 - 1))
        keep = h >= thresh
        scale = jnp.asarray(1.0 / (1.0 - dropout_p), compute_dtype)
        y = jnp.where(keep, y * scale, jnp.zeros((), compute_dtype))

    o_ref[...] = y.astype(o_ref.dtype)


def _choose_seq_tile(S: int, B: int, D: int, itemsize: int,
                     target_tile_bytes: int = 2 * 1024 * 1024) -> int:
    """Seq rows per tile so each (TS, B, D) buffer is ~2 MiB (double-buffered input
    + output + pe stays under the smallest default scoped VMEM across v5e/v6e/v7x)."""
    rows = target_tile_bytes // max(1, B * D * itemsize)
    rows = int(max(1, min(S, rows)))
    if rows < S and rows >= 8:
        rows = (rows // 8) * 8          # soft preference; leading dim has no HW constraint
    return rows


def positional_encoding(
    x: jnp.ndarray,          # (S, B, D)
    pe: jnp.ndarray,         # (max_len, 1, D)
    *,
    dropout_p: float = 0.1,
    training: bool = False,
    seed: int = 0,
) -> jnp.ndarray:
    S, B, D = x.shape
    assert S <= pe.shape[0], "sequence longer than positional-encoding table"

    if training and dropout_p >= 1.0:            # degenerate p == 1 (matches nn.Dropout)
        return jnp.zeros_like(x)

    itemsize = jnp.dtype(x.dtype).itemsize
    TS = _choose_seq_tile(S, B, D, itemsize)
    grid = (pl.cdiv(S, TS),)

    # bf16-native compute on chips with bf16 VALU; f32 otherwise.
    compute_dtype = jnp.bfloat16 if x.dtype == jnp.bfloat16 else jnp.float32

    kernel = functools.partial(
        _pos_enc_kernel,
        dropout_p=float(dropout_p),
        training=bool(training),
        compute_dtype=compute_dtype,
    )

    return pl.pallas_call(
        kernel,
        out_shape=jax.ShapeDtypeStruct((S, B, D), x.dtype),
        grid_spec=pltpu.PrefetchScalarGridSpec(
            num_scalar_prefetch=1,          # seed scalar lands in SMEM
            grid=grid,
            in_specs=[
                # x: tile the sequence axis; (B, D) kept full so the last two block
                # dims always satisfy layout constraints and the DMA is contiguous.
                pl.BlockSpec((TS, B, D), lambda i, seed_ref: (i, 0, 0)),
                # pe: full buffer passed in; rows selected by the index_map
                # (no wrapper-side pe[:S] slice/copy).
                pl.BlockSpec((TS, 1, D), lambda i, seed_ref: (i, 0, 0)),
            ],
            out_specs=pl.BlockSpec((TS, B, D), lambda i, seed_ref: (i, 0, 0)),
        ),
        compiler_params=pltpu.CompilerParams(
            # Independent tiles: shard the grid across v7x's two TensorCores.
            dimension_semantics=("parallel",),
        ),
    )(jnp.asarray([seed], jnp.int32), x, pe)


# -----------------------------------------------------------------------------
# Demo / check
# -----------------------------------------------------------------------------
if __name__ == "__main__":
    d_model = 32
    max_len = 64
    S, B = 8, 2
    p = 0.1

    key = jax.random.PRNGKey(0)
    x = jax.random.normal(key, (S, B, d_model), dtype=jnp.float32)
    pe = make_positional_encoding_table(max_len, d_model)

    # Eval-mode path (dropout is identity) — verifiable against a pure-JAX reference.
    out_eval = jax.block_until_ready(positional_encoding(x, pe, dropout_p=p, training=False))
    ref = np.asarray(x) + np.asarray(pe[:S])
    np.testing.assert_allclose(np.asarray(out_eval), ref, rtol=1e-6, atol=1e-6)

    # Training-mode path (in-kernel counter-hash inverted dropout).
    out_train = jax.block_until_ready(
        positional_encoding(x, pe, dropout_p=p, training=True, seed=1234)
    )
    ot = np.asarray(out_train)
    keep_mask = ot != 0.0
    drop_frac = 1.0 - keep_mask.mean()
    assert 0.01 <= drop_frac <= 0.3, f"implausible drop fraction {drop_frac:.3f} for p={p}"
    np.testing.assert_allclose(
        ot[keep_mask],
        (ref * np.float32(1.0 / (1.0 - p)))[keep_mask],
        rtol=1e-5, atol=1e-6,
    )

    print("KERNEL_OK")
</pallas_src>

<mosaic_0001>
module attributes {stable_mosaic.version = 11 : i64} {
  func.func @_pos_enc_kernel(%arg0: i32, %arg1: memref<1xi32, #tpu.memory_space<smem>>, %arg2: memref<8x2x32xf32, #tpu.memory_space<vmem>>, %arg3: memref<8x1x32xf32, #tpu.memory_space<vmem>>, %arg4: memref<8x2x32xf32, #tpu.memory_space<vmem>>) attributes {dimension_semantics = [#tpu.dimension_semantics<parallel>], iteration_bounds = array<i64: 1>, scalar_prefetch = 1 : i64, scratch_operands = 0 : i64, tpu.core_type = #tpu.core_type<tc>, window_params = [{transform_indices = @transform_0, window_bounds = array<i64: 8, 2, 32>}, {transform_indices = @transform_1, window_bounds = array<i64: 8, 1, 32>}, {transform_indices = @transform_2, window_bounds = array<i64: 8, 2, 32>}]} {
    %c0 = arith.constant 0 : index
    %c0_0 = arith.constant 0 : index
    %c0_1 = arith.constant 0 : index
    %0 = vector.load %arg2[%c0, %c0_0, %c0_1] : memref<8x2x32xf32, #tpu.memory_space<vmem>>, vector<8x2x32xf32>
    %c0_2 = arith.constant 0 : index
    %c0_3 = arith.constant 0 : index
    %c0_4 = arith.constant 0 : index
    %1 = vector.load %arg3[%c0_2, %c0_3, %c0_4] : memref<8x1x32xf32, #tpu.memory_space<vmem>>, vector<8x1x32xf32>
    %2 = vector.broadcast %1 : vector<8x1x32xf32> to vector<8x2x32xf32>
    %3 = arith.addf %0, %2 : vector<8x2x32xf32>
    %c0_5 = arith.constant 0 : index
    %c0_6 = arith.constant 0 : index
    %c0_7 = arith.constant 0 : index
    %4 = vector.load %arg4[%c0_5, %c0_6, %c0_7] : memref<8x2x32xf32, #tpu.memory_space<vmem>>, vector<8x2x32xf32>
    tpu.vector_store %arg4[%c0_5, %c0_6, %c0_7], %3 {strides = array<i32>} : memref<8x2x32xf32, #tpu.memory_space<vmem>>, vector<8x2x32xf32>,
    return
  }
  func.func @transform_0(%arg0: i32, %arg1: memref<1xi32, #tpu.memory_space<smem>>) -> (i32, i32, i32) {
    %c0_i32 = arith.constant 0 : i32
    %c0_i32_0 = arith.constant 0 : i32
    %c0_i32_1 = arith.constant 0 : i32
    return %arg0, %c0_i32, %c0_i32_0 : i32, i32, i32
  }
  func.func @transform_1(%arg0: i32, %arg1: memref<1xi32, #tpu.memory_space<smem>>) -> (i32, i32, i32) {
    %c0_i32 = arith.constant 0 : i32
    %c0_i32_0 = arith.constant 0 : i32
    %c0_i32_1 = arith.constant 0 : i32
    return %arg0, %c0_i32, %c0_i32_0 : i32, i32, i32
  }
  func.func @transform_2(%arg0: i32, %arg1: memref<1xi32, #tpu.memory_space<smem>>) -> (i32, i32, i32) {
    %c0_i32 = arith.constant 0 : i32
    %c0_i32_0 = arith.constant 0 : i32
    %c0_i32_1 = arith.constant 0 : i32
    return %arg0, %c0_i32, %c0_i32_0 : i32, i32, i32
  }
}

</mosaic_0001>

<bundles_post_ra>
// kernel: tpu_custom_call.1
= control target key start
LH: loop header
LB: loop body
LE: loop exit
PB: predicated region body
PF: predicated region fallthrough
CT: control target
= control target key end

     0   :  { %vm86_vm0 = vcmask 254976   ;;  %s226_s0 = inlined_call_operand.<no memory space> [shape: s32[1], index: 0, kind: input, shape index: {}]   ;;  %s227_s1 = inlined_call_operand.vmem [shape: f32[8,2,32], index: 1, kind: input, shape index: {}]   ;;  %s228_s2 = inlined_call_operand.vmem [shape: f32[64,1,32], index: 2, kind: input, shape index: {}]   ;;  %s229_s3 = inlined_call_operand.hbm [shape: f32[8,2,32], index: 3, kind: output, shape index: {}]  }
   0x1   :  { %v14_v0 = vld [vmem:[%s227_s1] sm:$0x3]  ;;  %v15_v3 = vld [vmem:[%s227_s1 + $0x2] sm:$0x3]  ;;  %v16_v5 = vld [vmem:[%s227_s1 + $0x4] sm:$0x3] }
   0x2   :  { %v111_v1 = vld [vmem:[%s228_s2] ss:$0 sm:$0xff]  ;;  %v112_v4 = vld [vmem:[%s228_s2 + $0x1] ss:$0 sm:$0xff]  ;;  %v113_v7 = vld [vmem:[%s228_s2 + $0x2] ss:$0 sm:$0xff] }
   0x3   :  { %v78_v2 = vadd.f32 %v111_v1, %v14_v0  ;;  %v79_v6 = vadd.f32 %v112_v4, %v15_v3  ;;  %v17_v8 = vld [vmem:[%s227_s1 + $0x6] sm:$0x3]  ;;  %v114_v9 = vld [vmem:[%s228_s2 + $0x3] ss:$0 sm:$0xff]  ;;  %v80_v10 = vadd.f32 %v113_v7, %v16_v5  ;;  %v18_v12 = vld [vmem:[%s227_s1 + $0x8] sm:$0x3] }
   0x4   :  { %v81_v11 = vadd.f32 %v114_v9, %v17_v8  ;;  %v115_v13 = vld [vmem:[%s228_s2 + $0x4] ss:$0 sm:$0xff]  ;;  %v19_v14 = vld [vmem:[%s227_s1 + $0xa] sm:$0x3]  ;;  %v116_v16 = vld [vmem:[%s228_s2 + $0x5] ss:$0 sm:$0xff] }
   0x5   :  { %87 = vst.msk [vmem:[#allocation4] sm:$0x3] %vm86_vm0, %v78_v2  ;;  %88 = vst.msk [vmem:[#allocation4 + $0x2] sm:$0x3] %vm86_vm0, %v79_v6  ;;  %v82_v15 = vadd.f32 %v115_v13, %v18_v12  ;;  %v20_v17 = vld [vmem:[%s227_s1 + $0xc] sm:$0x3]  ;;  %v83_v19 = vadd.f32 %v116_v16, %v19_v14 }
   0x6   :  { %v117_v18 = vld [vmem:[%s228_s2 + $0x6] ss:$0 sm:$0xff]  ;;  %89 = vst.msk [vmem:[#allocation4 + $0x4] sm:$0x3] %vm86_vm0, %v80_v10  ;;  %90 = vst.msk [vmem:[#allocation4 + $0x6] sm:$0x3] %vm86_vm0, %v81_v11 }
   0x7   :  { %v84_v20 = vadd.f32 %v117_v18, %v20_v17  ;;  %v21_v21 = vld [vmem:[%s227_s1 + $0xe] sm:$0x3]  ;;  %v118_v22 = vld [vmem:[%s228_s2 + $0x7] ss:$0 sm:$0xff] }
   0x8   :  { %9 = vsyncpa [#allocation5], 0  ;;  %91 = vst.msk [vmem:[#allocation4 + $0x8] sm:$0x3] %vm86_vm0, %v82_v15  ;;  %v85_v23 = vadd.f32 %v118_v22, %v21_v21  ;;  %s144_s0 = smov [#allocation4]  }
   0x9   :  { %s100_s16 = sshll.u32 %s144_s0, 4  ;;  %92 = vst.msk [vmem:[#allocation4 + $0xa] sm:$0x3] %vm86_vm0, %v83_v19  ;;  %93 = vst.msk [vmem:[#allocation4 + $0xc] sm:$0x3] %vm86_vm0, %v84_v20  ;;  %s101_s16 = int_to_ptr.vmem [resolvable:$true] %s100_s16 }
   0xa   :  { %94 = vst.msk [vmem:[#allocation4 + $0xe] sm:$0x3] %vm86_vm0, %v85_v23  ;;  %s122_s17 = scalar_lea.vmem %s101_s16, 256  ;;  %p127_p1 = scmp.lt.s32.totalorder %s101_s16, %s101_s16 }
   0xb   :  { %p123_p0 = scmp.ne.s32.totalorder %s101_s16, %s122_s17  ;;  %p128_p2 = scmp.lt.s32.totalorder %s122_s17, %s122_s17 }
   0xd   :  { %p129_p3 = por %p128_p2, %p127_p1 }
   0xf   :  { %p130_p4 = pnand %p129_p3, %p123_p0 }
  0x11   :  { %133 = shalt.err (!%p130_p4)
}
  0x12   :  { %s145_s1 = smov 32   ;;  %s146_s2 = smov 2  }
  0x13   :  { %106 = dma.vmem_to_hbm [thread:$0]  %s101_s16, 256, %s229_s3, [#allocation5], %s145_s1, %s145_s1, %s146_s2  }
  0x14   :  { %142 = dma.done.wait [#allocation5], 256  }
  0x15   :  { %143 = vsyncadd [#allocation5], 4294967040 }
  0x16   :  { %110 = vsyncpa [#allocation5], 1 }

</bundles_post_ra>
